<compile_context>
chip_gen: v6e
topology: v6e:2x2x1
jax: 0.10.0
libtpu: 0.0.40
codegen_flags: <defaults>
</compile_context>

<pallas_src>
import jax
import jax.numpy as jnp
from jax.experimental import pallas as pl
from jax.experimental.pallas import tpu as pltpu


def _sigmoid_mul_kernel(scale_ref, x_ref, o_ref):
    """scale_ref: (rows, 1) gate; x_ref / o_ref: (rows, HW)."""
    # f32 sigmoid on the tiny gate (EUP), multiply/store in feature-map dtype.
    s = jax.nn.sigmoid(scale_ref[...].astype(jnp.float32))
    o_ref[...] = (x_ref[...] * s.astype(x_ref.dtype)).astype(o_ref.dtype)


def _sigmoid_mul_nhwc_kernel(scale_ref, x_ref, o_ref):
    """scale_ref: (1, 1, C) lane-dense gate; x_ref / o_ref: (1, HW, C)."""
    s = jax.nn.sigmoid(scale_ref[...].astype(jnp.float32))
    o_ref[...] = (x_ref[...] * s.astype(x_ref.dtype)).astype(o_ref.dtype)


def sigmoid_mul(x172, x168, *, vmem_block_bytes=4 * 1024 * 1024):
    """Module-faithful entry: sigmoid(x172) * x168 with NCHW broadcasting.

    x172: (N, C, 1, 1)   per-channel gate (pre-sigmoid)
    x168: (N, C, H, W)   feature map
    returns (N, C, H, W)
    """
    n, c, h, w = x168.shape
    assert x172.shape == (n, c, 1, 1)
    nc, hw = n * c, h * w

    x_flat = x168.reshape(nc, hw)   # contiguous view: zero cost
    s_flat = x172.reshape(nc, 1)    # zero cost
    out_shape = jax.ShapeDtypeStruct((nc, hw), x168.dtype)

    bytes_per_row = hw * jnp.dtype(x168.dtype).itemsize
    total_bytes = nc * bytes_per_row

    if total_bytes <= vmem_block_bytes or nc % 16 != 0:
        # Real-model path: whole arrays resident in VMEM, no grid / index-map
        # bookkeeping at all — lowest possible dispatch overhead.
        out = pl.pallas_call(
            _sigmoid_mul_kernel,
            out_shape=out_shape,
        )(s_flat, x_flat)
    else:
        # Large-input path: tile channels with the biggest power-of-2 block
        # that fits the VMEM budget.  Starting from nc and halving keeps the
        # block a divisor of nc; the %16 guard keeps it a multiple of 8.
        rows_per_block = nc
        while (rows_per_block * bytes_per_row > vmem_block_bytes
               and rows_per_block % 16 == 0):
            rows_per_block //= 2
        n_blocks = nc // rows_per_block
        rb = rows_per_block
        out = pl.pallas_call(
            _sigmoid_mul_kernel,
            out_shape=out_shape,
            grid=(n_blocks,),
            in_specs=[
                pl.BlockSpec((rb, 1), lambda i: (i, 0)),
                pl.BlockSpec((rb, hw), lambda i: (i, 0)),
            ],
            out_specs=pl.BlockSpec((rb, hw), lambda i: (i, 0)),
            compiler_params=pltpu.CompilerParams(
                dimension_semantics=("parallel",),
            ),
        )(s_flat, x_flat)

    return out.reshape(n, c, h, w)


def sigmoid_mul_nhwc(scale, x_nhwc):
    """Channel-last variant for producers that already hold NHWC data.

    scale:  (N, C)        per-channel gate (pre-sigmoid)
    x_nhwc: (N, H, W, C)  feature map
    returns (N, H, W, C)

    Lanes map to C, so stores are unmasked whenever C % 128 == 0 (the real
    EfficientNetV2 shape has C = 640 = 5 * 128) and the gate is a lane-dense
    row broadcast over sublanes.
    """
    n, h, w, c = x_nhwc.shape
    assert scale.shape == (n, c)
    hw = h * w

    x_flat = x_nhwc.reshape(n, hw, c)   # zero cost
    s_flat = scale.reshape(n, 1, c)     # zero cost

    out = pl.pallas_call(
        _sigmoid_mul_nhwc_kernel,
        out_shape=jax.ShapeDtypeStruct((n, hw, c), x_nhwc.dtype),
        grid=(n,),
        in_specs=[
            pl.BlockSpec((1, 1, c), lambda i: (i, 0, 0)),
            pl.BlockSpec((1, hw, c), lambda i: (i, 0, 0)),
        ],
        out_specs=pl.BlockSpec((1, hw, c), lambda i: (i, 0, 0)),
        compiler_params=pltpu.CompilerParams(
            dimension_semantics=("parallel",),
        ),
    )(s_flat, x_flat)

    return out.reshape(n, h, w, c)


if __name__ == "__main__":
    key = jax.random.PRNGKey(0)
    k1, k2 = jax.random.split(key)

    # Small shapes consistent with the module's (N, C, H, W) / (N, C, 1, 1)
    # signature (real model: x168 [1, 640, 14, 14], x172 [1, 640, 1, 1]).
    n, c, h, w = 2, 32, 14, 14
    x168 = jax.random.normal(k1, (n, c, h, w), dtype=jnp.float32)
    x172 = jax.random.normal(k2, (n, c, 1, 1), dtype=jnp.float32)

    ref = jax.nn.sigmoid(x172) * x168

    # 1) Module-faithful NCHW entry, small-input (grid-less) path.
    out = sigmoid_mul(x172, x168)
    jax.block_until_ready(out)
    assert out.shape == (n, c, h, w)
    assert jnp.allclose(out, ref, atol=1e-6, rtol=1e-6)

    # 2) Force the tiled "parallel" path with a tiny VMEM budget so both code
    #    paths are exercised on this small test shape.
    out_tiled = sigmoid_mul(x172, x168, vmem_block_bytes=16 * 1024)
    jax.block_until_ready(out_tiled)
    assert jnp.allclose(out_tiled, ref, atol=1e-6, rtol=1e-6)

    # 3) Channel-last entry point (lane-dense layout); the transpose here is
    #    test-only plumbing to fabricate NHWC data.
    out_nhwc = sigmoid_mul_nhwc(
        x172.reshape(n, c), jnp.transpose(x168, (0, 2, 3, 1))
    )
    jax.block_until_ready(out_nhwc)
    assert jnp.allclose(
        jnp.transpose(out_nhwc, (0, 3, 1, 2)), ref, atol=1e-6, rtol=1e-6
    )

    print("KERNEL_OK")
</pallas_src>

<mosaic_0001>
module attributes {stable_mosaic.version = 11 : i64} {
  func.func @_sigmoid_mul_kernel(%arg0: memref<64x1xf32, #tpu.memory_space<vmem>>, %arg1: memref<64x196xf32, #tpu.memory_space<vmem>>, %arg2: memref<64x196xf32, #tpu.memory_space<vmem>>) attributes {dimension_semantics = [], scalar_prefetch = 0 : i64, scratch_operands = 0 : i64, tpu.core_type = #tpu.core_type<tc>} {
    %c0 = arith.constant 0 : index
    %c0_0 = arith.constant 0 : index
    %0 = vector.load %arg0[%c0, %c0_0] : memref<64x1xf32, #tpu.memory_space<vmem>>, vector<64x1xf32>
    %1 = arith.negf %0 : vector<64x1xf32>
    %2 = math.exp %1 : vector<64x1xf32>
    %cst = arith.constant 1.000000e+00 : f32
    %3 = vector.broadcast %cst : f32 to vector<64x1xf32>
    %4 = arith.addf %3, %2 : vector<64x1xf32>
    %5 = arith.divf %3, %4 : vector<64x1xf32>
    %c0_1 = arith.constant 0 : index
    %c0_2 = arith.constant 0 : index
    %6 = vector.load %arg1[%c0_1, %c0_2] : memref<64x196xf32, #tpu.memory_space<vmem>>, vector<64x196xf32>
    %7 = vector.broadcast %5 : vector<64x1xf32> to vector<64x196xf32>
    %8 = arith.mulf %6, %7 : vector<64x196xf32>
    %c0_3 = arith.constant 0 : index
    %c0_4 = arith.constant 0 : index
    %9 = vector.load %arg2[%c0_3, %c0_4] : memref<64x196xf32, #tpu.memory_space<vmem>>, vector<64x196xf32>
    tpu.vector_store %arg2[%c0_3, %c0_4], %8 {strides = array<i32>} : memref<64x196xf32, #tpu.memory_space<vmem>>, vector<64x196xf32>,
    return
  }
}

</mosaic_0001>

<bundles_post_ra>
// kernel: tpu_custom_call.1
= control target key start
LH: loop header
LB: loop body
LE: loop exit
PB: predicated region body
PF: predicated region fallthrough
CT: control target
= control target key end

     0   :  { %7 = vsyncpa [#allocation3], 0  ;;  %s343_s0 = inlined_call_operand.vmem [shape: f32[64,1], index: 0, kind: input, shape index: {}]   ;;  %s344_s1 = inlined_call_operand.hbm [shape: f32[64,196], index: 1, kind: input, shape index: {}]   ;;  %s345_s2 = inlined_call_operand.hbm [shape: f32[64,196], index: 2, kind: output, shape index: {}]  }
   0x1   :  { %8 = vsyncpa [#allocation4], 0  ;;  %s279_s9 = smov [#allocation2]  }
   0x2   :  { %s16_s10 = sshll.u32 %s279_s9, 4  ;;  %s17_s10 = int_to_ptr.vmem [resolvable:$true] %s16_s10 }
   0x3   :  { %s243_s11 = scalar_lea.vmem %s17_s10, 2048  ;;  %p248_p1 = scmp.lt.s32.totalorder %s17_s10, %s17_s10 }
   0x4   :  { %p244_p0 = scmp.ne.s32.totalorder %s17_s10, %s243_s11  ;;  %p249_p2 = scmp.lt.s32.totalorder %s243_s11, %s243_s11 }
   0x6   :  { %p250_p3 = por %p249_p2, %p248_p1 }
   0x8   :  { %p251_p4 = pnand %p250_p3, %p244_p0 }
   0xa   :  { %254 = shalt.err (!%p251_p4)
}
   0xb   :  { %s280_s12 = smov 256   ;;  %s281_s13 = smov 16  }
   0xc   :  { %22 = dma.hbm_to_vmem [thread:$0]  %s344_s1, 2048, %s17_s10, [#allocation3], %s280_s12, %s280_s12, %s281_s13  }
   0xd   :  { %275 = dma.done.wait [#allocation3], 2048  }
   0xe   :  { %276 = vsyncadd [#allocation3], 4294965248  ;;  %v282_v0 = vmov 0   ;;  %v28_v1 = vld [vmem:[%s343_s0 + $0x10] sm:$0xff]  ;;  %v26_v2 = vld [vmem:[%s343_s0] sm:$0xff]  ;;  %vm155_vm0 = vcmask 556032  }
   0xf   :  { %202 = vset.pattern.permute.xlu1 %v282_v0  ;;  %201 = vset.pattern.permute.xlu0 %v282_v0  ;;  %v29_v3 = vld [vmem:[%s343_s0 + $0x18] sm:$0xff]  ;;  %v190_v4 = vmul.f32 -1.442695, %v28_v1  ;;  %v188_v5 = vmul.f32 -1.442695, %v26_v2  ;;  %v27_v7 = vld [vmem:[%s343_s0 + $0x8] sm:$0xff] }
  0x10   :  { %v191_v6 = vmul.f32 -1.442695, %v29_v3  ;;  %v31_v8 = vld [vmem:[%s343_s0 + $0x28] sm:$0xff]  ;;  %v30_v9 = vld [vmem:[%s343_s0 + $0x20] sm:$0xff]  ;;  %v189_v10 = vmul.f32 -1.442695, %v27_v7 }
  0x11   :  { %203 = vpow2.f32 %v190_v4  ;;  %v193_v11 = vmul.f32 -1.442695, %v31_v8  ;;  %v192_v12 = vmul.f32 -1.442695, %v30_v9  ;;  %v33_v13 = vld [vmem:[%s343_s0 + $0x38] sm:$0xff]  ;;  %v32_v14 = vld [vmem:[%s343_s0 + $0x30] sm:$0xff] }
  0x12   :  { %205 = vpow2.f32 %v188_v5  ;;  %v195_v15 = vmul.f32 -1.442695, %v33_v13  ;;  %v194_v16 = vmul.f32 -1.442695, %v32_v14  ;;  %v86_v41 = vld [vmem:[#allocation2 + $0x20] sm:$0xff]  ;;  %v87_v42 = vld [vmem:[#allocation2 + $0x28] sm:$0xff] }
  0x13   :  { %207 = vpow2.f32 %v191_v6  ;;  %v82_v43 = vld [vmem:[#allocation2] sm:$0xff]  ;;  %v83_v44 = vld [vmem:[#allocation2 + $0x8] sm:$0xff]  ;;  %v88_v51 = vld [vmem:[#allocation2 + $0x30] sm:$0xff]  ;;  %s283_s0 = smov [#allocation5]  }
  0x14   :  { %209 = vpow2.f32 %v189_v10  ;;  %v89_v52 = vld [vmem:[#allocation2 + $0x38] sm:$0xff]  ;;  %v84_v53 = vld [vmem:[#allocation2 + $0x10] sm:$0xff]  ;;  %v90_v63 = vld [vmem:[#allocation2 + $0x40] sm:$0xff]  ;;  %s176_s3 = sshll.u32 %s283_s0, 4  ;;  %s177_s3 = int_to_ptr.vmem [resolvable:$true] %s176_s3 }
  0x15   :  { %211 = vpow2.f32 %v193_v11  ;;  %v85_v54 = vld [vmem:[#allocation2 + $0x18] sm:$0xff]  ;;  %v92_v61 = vld [vmem:[#allocation2 + $0x50] sm:$0xff]  ;;  %v91_v0 = vld [vmem:[#allocation2 + $0x48] sm:$0xff]  ;;  %s255_s4 = scalar_lea.vmem %s177_s3, 2048  ;;  %p260_p6 = scmp.lt.s32.totalorder %s177_s3, %s177_s3 }
  0x16   :  { %213 = vpow2.f32 %v192_v12  ;;  %v93_v62 = vld [vmem:[#allocation2 + $0x58] sm:$0xff]  ;;  %v96_v7 = vld [vmem:[#allocation2 + $0x70] sm:$0xff]  ;;  %v94_v9 = vld [vmem:[#allocation2 + $0x60] sm:$0xff]  ;;  %p256_p5 = scmp.ne.s32.totalorder %s177_s3, %s255_s4  ;;  %p261_p7 = scmp.lt.s32.totalorder %s255_s4, %s255_s4 }
  0x17   :  { %215 = vpow2.f32 %v195_v15  ;;  %v97_v8 = vld [vmem:[#allocation2 + $0x78] sm:$0xff]  ;;  %v95_v10 = vld [vmem:[#allocation2 + $0x68] sm:$0xff] }
  0x18   :  { %217 = vpow2.f32 %v194_v16  ;;  %p262_p8 = por %p261_p7, %p260_p6 }
  0x1a   :  { %p263_p9 = pnand %p262_p8, %p256_p5 }
  0x1e   :  { %v204_v17 = vpop.eup %203 }
  0x1f   :  { %v206_v18 = vpop.eup %205  ;;  %v60_v19 = vadd.f32 1.0, %v204_v17 }
  0x20   :  { %v208_v20 = vpop.eup %207  ;;  %v58_v21 = vadd.f32 1.0, %v206_v18 }
  0x21   :  { %v210_v22 = vpop.eup %209  ;;  %219 = vrcp.f32 %v60_v19  ;;  %v61_v23 = vadd.f32 1.0, %v208_v20 }
  0x22   :  { %v212_v24 = vpop.eup %211  ;;  %221 = vrcp.f32 %v58_v21  ;;  %v59_v25 = vadd.f32 1.0, %v210_v22 }
  0x23   :  { %v214_v26 = vpop.eup %213  ;;  %223 = vrcp.f32 %v61_v23  ;;  %v63_v27 = vadd.f32 1.0, %v212_v24 }
  0x24   :  { %v216_v28 = vpop.eup %215  ;;  %225 = vrcp.f32 %v59_v25  ;;  %v62_v29 = vadd.f32 1.0, %v214_v26 }
  0x25   :  { %v218_v30 = vpop.eup %217  ;;  %227 = vrcp.f32 %v63_v27  ;;  %v65_v31 = vadd.f32 1.0, %v216_v28 }
  0x26   :  { %229 = vrcp.f32 %v62_v29  ;;  %v64_v32 = vadd.f32 1.0, %v218_v30 }
  0x27   :  { %231 = vrcp.f32 %v65_v31 }
  0x28   :  { %233 = vrcp.f32 %v64_v32 }
  0x2e   :  { %v220_v33 = vpop.eup %219 }
  0x2f   :  { %v222_v34 = vpop.eup %221  ;;  %110 = vperm.xlu1 %202, %v220_v33  }
  0x30   :  { %v224_v35 = vpop.eup %223  ;;  %100 = vperm.xlu0 %201, %v222_v34  }
  0x31   :  { %v226_v36 = vpop.eup %225 }
  0x32   :  { %v228_v37 = vpop.eup %227 }
  0x33   :  { %115 = vperm.xlu1 %202, %v224_v35   ;;  %v230_v38 = vpop.eup %229 }
  0x34   :  { %105 = vperm.xlu0 %201, %v226_v36   ;;  %v232_v39 = vpop.eup %231 }
  0x35   :  { %v234_v40 = vpop.eup %233 }
  0x37   :  { %125 = vperm.xlu1 %202, %v228_v37  }
  0x38   :  { %120 = vperm.xlu0 %201, %v230_v38  }
  0x3b   :  { %135 = vperm.xlu1 %202, %v232_v39  }
  0x3c   :  { %130 = vperm.xlu0 %201, %v234_v40  }
  0xaa   :  { %v111_v45 = vpop.permute.xlu1 %110 }
  0xab   :  { %v142_v46 = vmul.f32 %v111_v45, %v86_v41  ;;  %v143_v47 = vmul.f32 %v111_v45, %v87_v42  ;;  %v101_v48 = vpop.permute.xlu0 %100 }
  0xac   :  { %v138_v49 = vmul.f32 %v101_v48, %v82_v43  ;;  %v139_v50 = vmul.f32 %v101_v48, %v83_v44 }
  0xad   :  { %159 = vst [vmem:[#allocation5 + $0x20] sm:$0xff] %v142_v46  ;;  %160 = vst.msk [vmem:[#allocation5 + $0x28] sm:$0xff] %vm155_vm0, %v143_v47 }
  0xae   :  { %154 = vst [vmem:[#allocation5] sm:$0xff] %v138_v49  ;;  %156 = vst.msk [vmem:[#allocation5 + $0x8] sm:$0xff] %vm155_vm0, %v139_v50  ;;  %v116_v55 = vpop.permute.xlu1 %115 }
  0xaf   :  { %v144_v56 = vmul.f32 %v116_v55, %v88_v51  ;;  %v145_v57 = vmul.f32 %v116_v55, %v89_v52  ;;  %v106_v58 = vpop.permute.xlu0 %105 }
  0xb0   :  { %v140_v59 = vmul.f32 %v106_v58, %v84_v53  ;;  %v141_v60 = vmul.f32 %v106_v58, %v85_v54 }
  0xb1   :  { %161 = vst [vmem:[#allocation5 + $0x30] sm:$0xff] %v144_v56  ;;  %162 = vst.msk [vmem:[#allocation5 + $0x38] sm:$0xff] %vm155_vm0, %v145_v57 }
  0xb2   :  { %157 = vst [vmem:[#allocation5 + $0x10] sm:$0xff] %v140_v59  ;;  %158 = vst.msk [vmem:[#allocation5 + $0x18] sm:$0xff] %vm155_vm0, %v141_v60  ;;  %v126_v1 = vpop.permute.xlu1 %125 }
  0xb3   :  { %v148_v2 = vmul.f32 %v126_v1, %v92_v61  ;;  %v149_v3 = vmul.f32 %v126_v1, %v93_v62  ;;  %v121_v4 = vpop.permute.xlu0 %120 }
  0xb4   :  { %v146_v5 = vmul.f32 %v121_v4, %v90_v63  ;;  %v147_v6 = vmul.f32 %v121_v4, %v91_v0 }
  0xb5   :  { %165 = vst [vmem:[#allocation5 + $0x50] sm:$0xff] %v148_v2  ;;  %166 = vst.msk [vmem:[#allocation5 + $0x58] sm:$0xff] %vm155_vm0, %v149_v3 }
  0xb6   :  { %163 = vst [vmem:[#allocation5 + $0x40] sm:$0xff] %v146_v5  ;;  %164 = vst.msk [vmem:[#allocation5 + $0x48] sm:$0xff] %vm155_vm0, %v147_v6  ;;  %v136_v11 = vpop.permute.xlu1 %135 }
  0xb7   :  { %v152_v12 = vmul.f32 %v136_v11, %v96_v7  ;;  %v153_v13 = vmul.f32 %v136_v11, %v97_v8  ;;  %v131_v14 = vpop.permute.xlu0 %130 }
  0xb8   :  { %v150_v15 = vmul.f32 %v131_v14, %v94_v9  ;;  %v151_v16 = vmul.f32 %v131_v14, %v95_v10 }
  0xb9   :  { %169 = vst [vmem:[#allocation5 + $0x70] sm:$0xff] %v152_v12  ;;  %170 = vst.msk [vmem:[#allocation5 + $0x78] sm:$0xff] %vm155_vm0, %v153_v13 }
  0xba   :  { %167 = vst [vmem:[#allocation5 + $0x60] sm:$0xff] %v150_v15  ;;  %168 = vst.msk [vmem:[#allocation5 + $0x68] sm:$0xff] %vm155_vm0, %v151_v16 }
  0xbb   :  { %266 = shalt.err (!%p263_p9)
}
  0xbc   :  { %182 = dma.vmem_to_hbm [thread:$0]  %s177_s3, 2048, %s345_s2, [#allocation4], %s280_s12, %s280_s12, %s281_s13  }
  0xbd   :  { %277 = dma.done.wait [#allocation4], 2048  }
  0xbe   :  { %278 = vsyncadd [#allocation4], 4294965248 }
  0xbf   :  { %186 = vsyncpa [#allocation3], 1 }
  0xc0   :  { %187 = vsyncpa [#allocation4], 1 }

</bundles_post_ra>
